<compile_context>
chip_gen: v7x
topology: tpu7x:2x2x1
jax: 0.10.0
libtpu: 0.0.40
codegen_flags: <defaults>
</compile_context>

<pallas_src>
import jax
import jax.numpy as jnp
from jax.experimental import pallas as pl
from jax.experimental.pallas import tpu as pltpu


def _round_up(x, m):
    return (x + m - 1) // m * m


def _onset_kernel(x_ref, w1_ref, b1_ref, w2_ref, b2_ref, o_ref):
    # x_ref : [TM, img_dim]       VMEM  (batch tile, features on lanes)
    # w1_ref: [hidden, img_dim]   VMEM  (resident; == linear_map.weight)
    # b1_ref: [hidden, 1]         VMEM  (resident)
    # w2_ref: [hidden, 1]         VMEM  (resident; == linear_single.weight.T)
    # b2_ref: [1, 1]              SMEM  (scalar bias)
    # o_ref : [1, TM]             VMEM  (lane-dense logits row for this tile)
    x = x_ref[...]
    w1 = w1_ref[...]

    # h^T[hidden, TM] = W_map @ x^T  (contract img_dim on both; MXU "trans_b"
    # form). Putting batch on lanes keeps everything downstream lane-dense.
    h_t = jax.lax.dot_general(
        w1, x, (((1,), (1,)), ((), ())),
        preferred_element_type=jnp.float32)
    h_t = jnp.tanh(h_t + b1_ref[...])                    # bias broadcast + EUP tanh

    # Second layer: VPU broadcast-multiply + XLU sublane reduction
    # (replaces the old [hidden,1] N=1 MXU matmul).
    logits = jnp.sum(h_t * w2_ref[...], axis=0, keepdims=True)   # [1, TM]
    logits = logits + b2_ref[0, 0]                       # scalar SMEM bias
    o_ref[...] = jnp.maximum(logits, 0.0)                # relu, lane-dense store


def clip_onset_forward(img_vectors, w_map, b_map, w_single, b_single,
                       *, block_b=1024, use_bf16_matmul=False):
    """Forward pass of CustomCLIPOnsetModel.

    img_vectors : [B, img_dim]
    w_map       : [hidden, img_dim]   (PyTorch linear_map.weight layout)
    b_map       : [hidden]
    w_single    : [1, hidden]         (PyTorch linear_single.weight layout)
    b_single    : [1]
    Returns logits [B, 1] float32.
    """
    B, img_dim = img_vectors.shape
    hidden = w_map.shape[0]

    # Batch tile: multiple of 128 so each tile's output row is lane-dense.
    tm = max(128, min(block_b, _round_up(B, 128)))
    b_pad = _round_up(B, tm)
    nt = b_pad // tm

    x = img_vectors.astype(jnp.float32)
    if b_pad != B:
        x = jnp.pad(x, ((0, b_pad - B), (0, 0)))

    w1 = w_map.astype(jnp.float32)
    if use_bf16_matmul:
        # v6e / v7x fast path: bf16 MXU operands, f32 accumulation/activations.
        x = x.astype(jnp.bfloat16)
        w1 = w1.astype(jnp.bfloat16)

    b1 = b_map.astype(jnp.float32).reshape(hidden, 1)
    w2 = w_single.astype(jnp.float32).reshape(hidden, 1)   # == weight.T
    b2 = b_single.astype(jnp.float32).reshape(1, 1)

    bytes_per = 2 if use_bf16_matmul else 4
    # Double-buffered x tile + resident weights + double-buffered out row,
    # with generous headroom for layout padding / internal scratch.
    vmem_bytes = (2 * tm * max(img_dim, 128) * bytes_per
                  + max(hidden, 8) * max(img_dim, 128) * bytes_per
                  + 2 * max(hidden, 8) * 128 * 4
                  + 2 * 8 * tm * 4)
    vmem_limit = min(max(2 * vmem_bytes, 16 << 20), 64 << 20)  # v7x-safe cap

    out = pl.pallas_call(
        _onset_kernel,
        out_shape=jax.ShapeDtypeStruct((1, b_pad), jnp.float32),
        grid=(nt,),
        in_specs=[
            pl.BlockSpec((tm, img_dim), lambda i: (i, 0)),        # x tiles
            pl.BlockSpec((hidden, img_dim), lambda i: (0, 0)),    # w1 resident
            pl.BlockSpec((hidden, 1), lambda i: (0, 0)),          # b1 resident
            pl.BlockSpec((hidden, 1), lambda i: (0, 0)),          # w2 resident
            pl.BlockSpec(memory_space=pltpu.MemorySpace.SMEM),    # b2 scalar
        ],
        out_specs=pl.BlockSpec((1, tm), lambda i: (0, i)),
        compiler_params=pltpu.CompilerParams(
            dimension_semantics=("parallel",),
            vmem_limit_bytes=int(vmem_limit),
        ),
        cost_estimate=pl.CostEstimate(
            flops=2 * b_pad * img_dim * hidden + 3 * b_pad * hidden,
            transcendentals=b_pad * hidden,
            bytes_accessed=(b_pad * img_dim * bytes_per
                            + hidden * img_dim * bytes_per
                            + (2 * hidden + 1) * 4
                            + b_pad * 4),
        ),
    )(x, w1, b1, w2, b2)

    # Lane-dense [1, B_pad] row -> [B, 1] column (wrapper-side layout plumbing).
    return out[0, :B].reshape(B, 1)


def init_params(key, img_dim, hidden_dim):
    """Mirror CustomCLIPOnsetModel.init_weights: weights ~ U(-0.1, 0.1), biases = 0."""
    k1, k2 = jax.random.split(key)
    w_map = jax.random.uniform(k1, (hidden_dim, img_dim), jnp.float32, -0.1, 0.1)
    b_map = jnp.zeros((hidden_dim,), jnp.float32)
    w_single = jax.random.uniform(k2, (1, hidden_dim), jnp.float32, -0.1, 0.1)
    b_single = jnp.zeros((1,), jnp.float32)
    return w_map, b_map, w_single, b_single


if __name__ == "__main__":
    key = jax.random.PRNGKey(0)
    batch, seq, img_dim, hidden_dim = 2, 8, 32, 32

    k_img, k_params, k_b1, k_b2 = jax.random.split(key, 4)
    # Unused by the forward pass (kept for interface fidelity with the module).
    input_ids = jnp.zeros((batch, seq), jnp.int32)
    attention_mask = jnp.ones((batch, seq), jnp.int32)
    img_vectors = jax.random.normal(k_img, (batch, img_dim), jnp.float32)

    w_map, b_map, w_single, b_single = init_params(k_params, img_dim, hidden_dim)
    # Use non-zero biases here so the bias paths are actually exercised
    # (module init uses zeros).
    b_map = 0.05 * jax.random.normal(k_b1, (hidden_dim,), jnp.float32)
    b_single = 0.05 * jax.random.normal(k_b2, (1,), jnp.float32)

    logits = clip_onset_forward(img_vectors, w_map, b_map, w_single, b_single)
    logits = jax.block_until_ready(logits)

    # Reference in plain JAX (same math as the PyTorch forward).
    ref = jnp.maximum(
        jnp.tanh(img_vectors @ w_map.T + b_map) @ w_single.T + b_single, 0.0)
    assert logits.shape == (batch, 1)
    assert jnp.allclose(logits, ref, atol=1e-5), "mismatch vs reference"

    print("KERNEL_OK")
</pallas_src>

<mosaic_0001>
module attributes {stable_mosaic.version = 11 : i64} {
  func.func @_onset_kernel(%arg0: i32, %arg1: memref<128x32xf32, #tpu.memory_space<vmem>>, %arg2: memref<32x32xf32, #tpu.memory_space<vmem>>, %arg3: memref<32x1xf32, #tpu.memory_space<vmem>>, %arg4: memref<32x1xf32, #tpu.memory_space<vmem>>, %arg5: memref<1x1xf32, #tpu.memory_space<smem>>, %arg6: memref<1x128xf32, #tpu.memory_space<vmem>>) attributes {dimension_semantics = [#tpu.dimension_semantics<parallel>], iteration_bounds = array<i64: 1>, scalar_prefetch = 0 : i64, scratch_operands = 0 : i64, tpu.core_type = #tpu.core_type<tc>, window_params = [{transform_indices = @transform_0, window_bounds = array<i64: 128, 32>}, {pipeline_mode = #tpu.pipeline_mode<synchronous>, transform_indices = @transform_1, window_bounds = array<i64: 32, 32>}, {pipeline_mode = #tpu.pipeline_mode<synchronous>, transform_indices = @transform_2, window_bounds = array<i64: 32, 1>}, {pipeline_mode = #tpu.pipeline_mode<synchronous>, transform_indices = @transform_3, window_bounds = array<i64: 32, 1>}, {transform_indices = @transform_4, window_bounds = array<i64: 1, 1>}, {transform_indices = @transform_5, window_bounds = array<i64: 1, 128>}]} {
    %c0 = arith.constant 0 : index
    %c0_0 = arith.constant 0 : index
    %0 = vector.load %arg1[%c0, %c0_0] : memref<128x32xf32, #tpu.memory_space<vmem>>, vector<128x32xf32>
    %c0_1 = arith.constant 0 : index
    %c0_2 = arith.constant 0 : index
    %1 = vector.load %arg2[%c0_1, %c0_2] : memref<32x32xf32, #tpu.memory_space<vmem>>, vector<32x32xf32>
    %cst = arith.constant dense<0.000000e+00> : vector<32x128xf32>
    %2 = tpu.matmul %1, %0, %cst {dimension_numbers = #tpu.dot_dimension_numbers<[1], [1], [0], [0], [0, 0, 1, 0], [], []>} : vector<32x32xf32>, vector<128x32xf32>, vector<32x128xf32> -> vector<32x128xf32>
    %c0_3 = arith.constant 0 : index
    %c0_4 = arith.constant 0 : index
    %3 = vector.load %arg3[%c0_3, %c0_4] : memref<32x1xf32, #tpu.memory_space<vmem>>, vector<32x1xf32>
    %4 = vector.broadcast %3 : vector<32x1xf32> to vector<32x128xf32>
    %5 = arith.addf %2, %4 : vector<32x128xf32>
    %6 = math.tanh %5 : vector<32x128xf32>
    %c0_5 = arith.constant 0 : index
    %c0_6 = arith.constant 0 : index
    %7 = vector.load %arg4[%c0_5, %c0_6] : memref<32x1xf32, #tpu.memory_space<vmem>>, vector<32x1xf32>
    %8 = vector.broadcast %7 : vector<32x1xf32> to vector<32x128xf32>
    %9 = arith.mulf %6, %8 : vector<32x128xf32>
    %cst_7 = arith.constant dense<0.000000e+00> : vector<128xf32>
    %10 = vector.multi_reduction <add>, %9, %cst_7 [0] : vector<32x128xf32> to vector<128xf32>
    %11 = vector.shape_cast %10 : vector<128xf32> to vector<1x128xf32>
    %c0_8 = arith.constant 0 : index
    %c0_9 = arith.constant 0 : index
    %12 = memref.load %arg5[%c0_8, %c0_9] : memref<1x1xf32, #tpu.memory_space<smem>>
    %13 = vector.broadcast %12 : f32 to vector<1x128xf32>
    %14 = arith.addf %11, %13 : vector<1x128xf32>
    %cst_10 = arith.constant 0.000000e+00 : f32
    %15 = vector.broadcast %cst_10 : f32 to vector<1x128xf32>
    %16 = arith.maximumf %14, %15 : vector<1x128xf32>
    %c0_11 = arith.constant 0 : index
    %c0_12 = arith.constant 0 : index
    %17 = vector.load %arg6[%c0_11, %c0_12] : memref<1x128xf32, #tpu.memory_space<vmem>>, vector<1x128xf32>
    tpu.vector_store %arg6[%c0_11, %c0_12], %16 {strides = array<i32>} : memref<1x128xf32, #tpu.memory_space<vmem>>, vector<1x128xf32>,
    return
  }
  func.func @transform_0(%arg0: i32) -> (i32, i32) {
    %c0_i32 = arith.constant 0 : i32
    %c0_i32_0 = arith.constant 0 : i32
    return %arg0, %c0_i32 : i32, i32
  }
  func.func @transform_1(%arg0: i32) -> (i32, i32) {
    %c0_i32 = arith.constant 0 : i32
    %c0_i32_0 = arith.constant 0 : i32
    %c0_i32_1 = arith.constant 0 : i32
    return %c0_i32, %c0_i32_0 : i32, i32
  }
  func.func @transform_2(%arg0: i32) -> (i32, i32) {
    %c0_i32 = arith.constant 0 : i32
    %c0_i32_0 = arith.constant 0 : i32
    %c0_i32_1 = arith.constant 0 : i32
    return %c0_i32, %c0_i32_0 : i32, i32
  }
  func.func @transform_3(%arg0: i32) -> (i32, i32) {
    %c0_i32 = arith.constant 0 : i32
    %c0_i32_0 = arith.constant 0 : i32
    %c0_i32_1 = arith.constant 0 : i32
    return %c0_i32, %c0_i32_0 : i32, i32
  }
  func.func @transform_4(%arg0: i32) -> (i32, i32) {
    %c0_i32 = arith.constant 0 : i32
    %c0_i32_0 = arith.constant 0 : i32
    %c0_i32_1 = arith.constant 0 : i32
    return %c0_i32, %c0_i32_0 : i32, i32
  }
  func.func @transform_5(%arg0: i32) -> (i32, i32) {
    %c0_i32 = arith.constant 0 : i32
    %c0_i32_0 = arith.constant 0 : i32
    return %c0_i32, %arg0 : i32, i32
  }
}

</mosaic_0001>

<bundles_post_ra>
// kernel: tpu_custom_call.1
= control target key start
LH: loop header
LB: loop body
LE: loop exit
PB: predicated region body
PF: predicated region fallthrough
CT: control target
= control target key end

     0   :  { %vm66_vm0 = vcmask 261120   ;;  %v450_v6 = vmov 0   ;;  %s655_s0 = inlined_call_operand.vmem [shape: f32[128,32], index: 0, kind: input, shape index: {}]   ;;  %s656_s1 = inlined_call_operand.vmem [shape: f32[32,32], index: 1, kind: input, shape index: {}]   ;;  %s657_s2 = inlined_call_operand.vmem [shape: f32[32,1], index: 2, kind: input, shape index: {}]   ;;  %s658_s3 = inlined_call_operand.vmem [shape: f32[32,1], index: 3, kind: input, shape index: {}]   ;;  %s659_s4 = inlined_call_operand.<no memory space> [shape: f32[1,1], index: 4, kind: input, shape index: {}]   ;;  %s660_s5 = inlined_call_operand.hbm [shape: f32[1,128], index: 5, kind: output, shape index: {}]  }
   0x1   :  { %v22_v0 = vld [vmem:[%s655_s0] sm:$0xff]  ;;  %v23_v1 = vld [vmem:[%s655_s0 + $0x8] sm:$0xff]  ;;  %v24_v2 = vld [vmem:[%s655_s0 + $0x10] sm:$0xff]  ;;  %416 = vset.pattern.permute.xlu0 %v450_v6  ;;  %417 = vset.pattern.permute.xlu1 %v450_v6 }
   0x2   :  { %v350_v3 = vpack.c.bf16 %v23_v1, %v22_v0  ;;  %vm493_vm1 = vmpackc.low %vm66_vm0, %vm66_vm0  ;;  %v25_v5 = vld [vmem:[%s655_s0 + $0x18] sm:$0xff]  ;;  %v38_v8 = vld [vmem:[%s656_s1] sm:$0xff] }
   0x3   :  { %v356_v7 = vpack.c.bf16 %v25_v5, %v24_v2  ;;  %v26_v9 = vld [vmem:[%s655_s0 + $0x20] sm:$0xff]  ;;  %v27_v10 = vld [vmem:[%s655_s0 + $0x28] sm:$0xff]  ;;  %344 = vmatprep.mubr.msk.f32.mxu0 %vm66_vm0, %v38_v8  ;;  %v40_v11 = vld [vmem:[%s656_s1 + $0x10] sm:$0xff] }
   0x4   :  { %352 = vmatprep.subr.msk.bf16.mxu0 %vm493_vm1, %v350_v3  ;;  %398 = vmatprep.subr.msk.bf16.mxu1 %vm493_vm1, %v350_v3  ;;  %v42_v12 = vld [vmem:[%s657_s2] sm:$0xff]  ;;  %v44_v13 = vld [vmem:[%s657_s2 + $0x10] sm:$0xff]  ;;  %v362_v14 = vpack.c.bf16 %v27_v10, %v26_v9 }
   0x5   :  { %355 = vmatpush3.bf16.xpose.msk.msra.mxu0 %vm493_vm1, %v350_v3  ;;  %406 = vmatpush3.bf16.xpose.msk.msra.mxu1 %vm493_vm1, %v350_v3 }
   0x6   :  { %358 = vmatprep.subr.msk.bf16.mxu0 %vm493_vm1, %v356_v7  ;;  %399 = vmatprep.subr.msk.bf16.mxu1 %vm493_vm1, %v356_v7 }
   0x7   :  { %347 = vmatprep.mubr.msk.f32.mxu1 %vm66_vm0, %v40_v11  ;;  %48 = vperm.xlu0 %416, %v42_v12  }
   0x8   :  { %58 = vperm.xlu1 %417, %v44_v13  }
   0x9   :  { %11 = vsyncpa [#allocation4], 0  ;;  %v43_v15 = vld [vmem:[%s657_s2 + $0x8] sm:$0xff]  ;;  %v45_v16 = vld [vmem:[%s657_s2 + $0x18] sm:$0xff]  ;;  %v254_v6 = vstv %s659_s4  ;;  %s451_s21 = smov [#allocation3]  }
   0xa   :  { %v28_v17 = vld [vmem:[%s655_s0 + $0x30] sm:$0xff]  ;;  %v29_v18 = vld [vmem:[%s655_s0 + $0x38] sm:$0xff]  ;;  %v216_v19 = vld [vmem:[%s658_s3] sm:$0xff]  ;;  %s264_s22 = sshll.u32 %s451_s21, 4  ;;  %s265_s22 = int_to_ptr.vmem [resolvable:$true] %s264_s22 }
   0xb   :  { %53 = vperm.xlu0 %416, %v43_v15   ;;  %v217_v20 = vld [vmem:[%s658_s3 + $0x8] sm:$0xff]  ;;  %v368_v21 = vpack.c.bf16 %v29_v18, %v28_v17  ;;  %v218_v22 = vld [vmem:[%s658_s3 + $0x10] sm:$0xff]  ;;  %v219_v23 = vld [vmem:[%s658_s3 + $0x18] sm:$0xff]  ;;  %s426_s23 = scalar_lea.vmem %s265_s22, 16  ;;  %s430_s24 = scalar_lea.vmem %s265_s22, 32 }
   0xc   :  { %63 = vperm.xlu1 %417, %v45_v16   ;;  %v30_v24 = vld [vmem:[%s655_s0 + $0x40] sm:$0xff]  ;;  %v31_v25 = vld [vmem:[%s655_s0 + $0x48] sm:$0xff]  ;;  %v32_v27 = vld [vmem:[%s655_s0 + $0x50] sm:$0xff]  ;;  %p427_p0 = scmp.ne.s32.totalorder %s265_s22, %s426_s23  ;;  %p431_p1 = scmp.lt.s32.totalorder %s265_s22, %s265_s22 }
   0xd   :  { %361 = vmatpush3.bf16.xpose.msk.msra.mxu0 %vm493_vm1, %v356_v7  ;;  %407 = vmatpush3.bf16.xpose.msk.msra.mxu1 %vm493_vm1, %v356_v7  ;;  %v374_v26 = vpack.c.bf16 %v31_v25, %v30_v24  ;;  %v33_v28 = vld [vmem:[%s655_s0 + $0x58] sm:$0xff]  ;;  %v34_v30 = vld [vmem:[%s655_s0 + $0x60] sm:$0xff]  ;;  %v35_v31 = vld [vmem:[%s655_s0 + $0x68] sm:$0xff]  ;;  %p432_p2 = scmp.lt.s32.totalorder %s430_s24, %s426_s23 }
   0xe   :  { %364 = vmatprep.subr.msk.bf16.mxu0 %vm493_vm1, %v362_v14  ;;  %400 = vmatprep.subr.msk.bf16.mxu1 %vm493_vm1, %v362_v14  ;;  %v380_v29 = vpack.c.bf16 %v33_v28, %v32_v27  ;;  %v386_v32 = vpack.c.bf16 %v35_v31, %v34_v30  ;;  %v36_v33 = vld [vmem:[%s655_s0 + $0x70] sm:$0xff]  ;;  %v37_v34 = vld [vmem:[%s655_s0 + $0x78] sm:$0xff]  ;;  %v39_v36 = vld [vmem:[%s656_s1 + $0x8] sm:$0xff] }
   0xf   :  { %222 = vperm.xlu0 %416, %v216_v19   ;;  %v392_v35 = vpack.c.bf16 %v37_v34, %v36_v33  ;;  %v41_v37 = vld [vmem:[%s656_s1 + $0x18] sm:$0xff]  ;;  %p433_p3 = por %p432_p2, %p431_p1 }
  0x10   :  { %227 = vperm.xlu1 %417, %v217_v20  }
  0x11   :  { %p434_p4 = pnand %p433_p3, %p427_p0 }
  0x13   :  { %232 = vperm.xlu0 %416, %v218_v22  }
  0x14   :  { %237 = vperm.xlu1 %417, %v219_v23  }
  0x15   :  { %367 = vmatpush3.bf16.xpose.msk.msra.mxu0 %vm493_vm1, %v362_v14  ;;  %408 = vmatpush3.bf16.xpose.msk.msra.mxu1 %vm493_vm1, %v362_v14 }
  0x16   :  { %370 = vmatprep.subr.msk.bf16.mxu0 %vm493_vm1, %v368_v21  ;;  %401 = vmatprep.subr.msk.bf16.mxu1 %vm493_vm1, %v368_v21 }
  0x1d   :  { %373 = vmatpush3.bf16.xpose.msk.msra.mxu0 %vm493_vm1, %v368_v21  ;;  %409 = vmatpush3.bf16.xpose.msk.msra.mxu1 %vm493_vm1, %v368_v21 }
  0x1e   :  { %376 = vmatprep.subr.msk.bf16.mxu0 %vm493_vm1, %v374_v26  ;;  %402 = vmatprep.subr.msk.bf16.mxu1 %vm493_vm1, %v374_v26 }
  0x25   :  { %379 = vmatpush3.bf16.xpose.msk.msra.mxu0 %vm493_vm1, %v374_v26  ;;  %410 = vmatpush3.bf16.xpose.msk.msra.mxu1 %vm493_vm1, %v374_v26 }
  0x26   :  { %382 = vmatprep.subr.msk.bf16.mxu0 %vm493_vm1, %v380_v29  ;;  %403 = vmatprep.subr.msk.bf16.mxu1 %vm493_vm1, %v380_v29 }
  0x2d   :  { %385 = vmatpush3.bf16.xpose.msk.msra.mxu0 %vm493_vm1, %v380_v29  ;;  %411 = vmatpush3.bf16.xpose.msk.msra.mxu1 %vm493_vm1, %v380_v29 }
  0x2e   :  { %388 = vmatprep.subr.msk.bf16.mxu0 %vm493_vm1, %v386_v32  ;;  %404 = vmatprep.subr.msk.bf16.mxu1 %vm493_vm1, %v386_v32 }
  0x35   :  { %391 = vmatpush3.bf16.xpose.msk.msra.mxu0 %vm493_vm1, %v386_v32  ;;  %412 = vmatpush3.bf16.xpose.msk.msra.mxu1 %vm493_vm1, %v386_v32 }
  0x36   :  { %394 = vmatprep.subr.msk.bf16.mxu0 %vm493_vm1, %v392_v35  ;;  %405 = vmatprep.subr.msk.bf16.mxu1 %vm493_vm1, %v392_v35 }
  0x3d   :  { %397 = vmatpush3.bf16.xpose.msk.msra.mxu0 %vm493_vm1, %v392_v35  ;;  %413 = vmatpush3.bf16.xpose.msk.msra.mxu1 %vm493_vm1, %v392_v35 }
  0x44   :  { %345 = vmatmul.mubr.msk.f32.vlgmr.msra.gmra.mrb[0].mxu0 %vm66_vm0, %v39_v36  ;;  %348 = vmatmul.mubr.msk.f32.vlgmr.msra.gmra.mrb[0].mxu1 %vm66_vm0, %v41_v37 }
  0x86   :  { %v49_v38 = vpop.permute.xlu0 %48 }
  0x87   :  { %v59_v39 = vpop.permute.xlu1 %58 }
  0x8a   :  { %v54_v40 = vpop.permute.xlu0 %53 }
  0x8b   :  { %v64_v46 = vpop.permute.xlu1 %63 }
  0x8e   :  { %v223_v50 = vpop.permute.xlu0 %222 }
  0x8f   :  { %v228_v52 = vpop.permute.xlu1 %227 }
  0x92   :  { %v233_v58 = vpop.permute.xlu0 %232 }
  0x93   :  { %v238_v61 = vpop.permute.xlu1 %237 }
 0x117   :  { %v346_v41 = vpop.f32.mrb[0].mxu0  ;;  %v349_v42 = vpop.f32.mrb[0].mxu1 }
 0x118   :  { %v199_v43 = vadd.f32 %v346_v41, %v54_v40  ;;  %v193_v44 = vpop.f32.mrb[1].mxu0  ;;  %v203_v45 = vpop.f32.mrb[1].mxu1  ;;  %v209_v49 = vadd.f32 %v349_v42, %v64_v46 }
 0x119   :  { %v194_v47 = vadd.f32 %v193_v44, %v49_v38  ;;  %v204_v48 = vadd.f32 %v203_v45, %v59_v39 }
 0x11a   :  { %418 = vtanh.f32 %v199_v43 }
 0x11b   :  { %420 = vtanh.f32 %v194_v47 }
 0x11c   :  { %422 = vtanh.f32 %v204_v48 }
 0x11d   :  { %424 = vtanh.f32 %v209_v49 }
 0x124   :  { %v419_v51 = vpop.eup %418 }
 0x125   :  { %v241_v53 = vmul.f32 %v419_v51, %v228_v52  ;;  %v421_v54 = vpop.eup %420 }
 0x126   :  { %v423_v55 = vpop.eup %422  ;;  %v240_v56 = vmul.f32 %v421_v54, %v223_v50 }
 0x127   :  { %v425_v57 = vpop.eup %424  ;;  %v242_v60 = vmul.f32 %v423_v55, %v233_v58 }
 0x128   :  { %v244_v59 = vadd.f32 %v241_v53, %v240_v56  ;;  %v243_v62 = vmul.f32 %v425_v57, %v238_v61 }
 0x12a   :  { %v245_v63 = vadd.f32 %v244_v59, %v242_v60 }
 0x12c   :  { %v246_v0 = vadd.f32 %v245_v63, %v243_v62 }
 0x12e   :  { %v247_v1 = vrot.slane %v246_v0, 4 }
 0x130   :  { %v248_v2 = vadd.f32 %v247_v1, %v246_v0 }
 0x132   :  { %v249_v3 = vrot.slane %v248_v2, 2 }
 0x134   :  { %v250_v4 = vadd.f32 %v249_v3, %v248_v2 }
 0x136   :  { %v251_v5 = vrot.slane %v250_v4, 1 }
 0x138   :  { %v252_v7 = vadd.f32 %v251_v5, %v250_v4 }
 0x13a   :  { %v255_v8 = vadd.f32 %v254_v6, %v252_v7 }
 0x13c   :  { %v256_v9 = vmax.f32 %v255_v8, 0.0 }
 0x13e   :  { %257 = vst [vmem:[#allocation3] sm:$0x1] %v256_v9 }
 0x13f   :  { %437 = shalt.err (!%p434_p4)
}
 0x140   :  { %s438_s27 = scalar_lea.hbm %s660_s5, 16 }
 0x141   :  { %p439_p5 = scmp.ne.s32.totalorder %s660_s5, %s438_s27  ;;  %p442_p6 = scmp.lt.u32.totalorder %s438_s27, %s660_s5 }
 0x143   :  { %p444_p7 = pnand %p442_p6, %p439_p5 }
 0x145   :  { %447 = shalt.err (!%p444_p7)
}
 0x146   :  { %267 = dma.vmem_to_hbm [thread:$0]  %s265_s22, 16, %s660_s5, [#allocation4]  }
 0x147   :  { %448 = dma.done.wait [#allocation4], 16  }
 0x148   :  { %449 = vsyncadd [#allocation4], 4294967280 }
 0x149   :  { %271 = vsyncpa [#allocation4], 1 }

</bundles_post_ra>
